<compile_context>
chip_gen: v7x
topology: tpu7x:2x2x1
jax: 0.10.0
libtpu: 0.0.40
codegen_flags: <defaults>
</compile_context>

<pallas_src>
import functools

import jax
import jax.numpy as jnp
from jax.experimental import pallas as pl
from jax.experimental.pallas import tpu as pltpu

EPS = 1e-5  # torch.nn.LayerNorm default


def _round_up(x: int, m: int) -> int:
    return ((x + m - 1) // m) * m


def _choose_tile(M: int, tm: int) -> int:
    """Row tile <= tm covering M with minimal padding; >=2 grid steps for
    large M so the 1-D 'parallel' grid can split across two TensorCores."""
    tm = max(8, _round_up(tm, 8))
    if M <= tm and M <= 1024:
        return max(8, _round_up(M, 8))          # single step, minimal pad
    steps = max(2, pl.cdiv(M, tm))              # >= 2 steps for large M (v7x)
    return min(tm, _round_up(pl.cdiv(M, steps), 8))


def _bs_embed_kernel(x_ref, w1_ref, v1_ref, w2_ref, v2_ref, o_ref, *, out_dim):
    x = x_ref[...].astype(jnp.float32)

    b1, g1, be1 = v1_ref[0:1, :], v1_ref[1:2, :], v1_ref[2:3, :]
    b2, g2, be2 = v2_ref[0:1, :], v2_ref[1:2, :], v2_ref[2:3, :]

    # feature_mixer: Linear + ReLU (+ Dropout=id) + LayerNorm (full width)
    h = jnp.dot(x, w1_ref[...], preferred_element_type=jnp.float32) + b1
    h = jnp.maximum(h, 0.0)
    mu1 = jnp.mean(h, axis=-1, keepdims=True)
    d1 = h - mu1
    var1 = jnp.mean(d1 * d1, axis=-1, keepdims=True)   # biased, like torch LN
    h = d1 * jax.lax.rsqrt(var1 + EPS) * g1 + be1

    # output_mixer: Linear (out columns zero-padded to 128 lanes) + ReLU
    y = jnp.dot(h, w2_ref[...], preferred_element_type=jnp.float32) + b2
    y = jnp.maximum(y, 0.0)

    # final LayerNorm over the first `out_dim` lanes only; padded lanes are
    # zero (zero-padded W2/b2), and the mask keeps them out of the variance.
    n_pad = y.shape[-1]
    lane = jax.lax.broadcasted_iota(jnp.int32, (1, n_pad), 1)
    mask = lane < out_dim
    inv_n = 1.0 / out_dim
    mu2 = jnp.sum(y, axis=-1, keepdims=True) * inv_n    # pads contribute 0
    d2 = jnp.where(mask, y - mu2, 0.0)
    var2 = jnp.sum(d2 * d2, axis=-1, keepdims=True) * inv_n
    out = d2 * jax.lax.rsqrt(var2 + EPS) * g2 + be2     # padded lanes -> 0

    o_ref[...] = out.astype(o_ref.dtype)


@functools.partial(jax.jit, static_argnames=("tm",))
def context_free_bs_embedding(feat, params, *, tm=4096):
    """feat: [..., feat_in] float32. Returns [..., out_dim] float32."""
    w1, b1, g1, be1, w2, b2, g2, be2 = params
    feat_in, feat_out = w1.shape
    out_dim = w2.shape[1]
    out_pad = max(128, _round_up(out_dim, 128))          # lane-dense output

    lead_shape = feat.shape[:-1]
    x2d = feat.reshape(-1, feat_in)
    M = x2d.shape[0]

    tm_eff = _choose_tile(M, tm)
    M_pad = _round_up(M, tm_eff)
    if M_pad != M:
        x2d = jnp.pad(x2d, ((0, M_pad - M), (0, 0)))
    grid_m = M_pad // tm_eff

    # Stack per-feature vectors (fewer inputs / DMA descriptors) and zero-pad
    # the output-side params so the kernel writes a dense 128-lane block.
    vecs1 = jnp.concatenate([b1, g1, be1], axis=0)                       # (3, feat_out)
    w2p = jnp.pad(w2, ((0, 0), (0, out_pad - out_dim)))                  # (feat_out, out_pad)
    vecs2 = jnp.pad(jnp.concatenate([b2, g2, be2], axis=0),
                    ((0, 0), (0, out_pad - out_dim)))                    # (3, out_pad)

    flops = 2 * M_pad * (feat_in * feat_out + feat_out * out_pad)
    bytes_accessed = (
        M_pad * (feat_in + out_pad) * 4                       # activations in/out
        + (feat_in * feat_out + feat_out * out_pad) * 4       # weights
        + 3 * (feat_out + out_pad) * 4                        # bias / LN vectors
    )
    cost = pl.CostEstimate(flops=flops,
                           transcendentals=2 * M_pad,         # two rsqrt per row
                           bytes_accessed=bytes_accessed)

    kernel = functools.partial(_bs_embed_kernel, out_dim=out_dim)

    out = pl.pallas_call(
        kernel,
        out_shape=jax.ShapeDtypeStruct((M_pad, out_pad), jnp.float32),
        grid_spec=pltpu.PrefetchScalarGridSpec(
            num_scalar_prefetch=0,
            grid=(grid_m,),
            in_specs=[
                pl.BlockSpec((tm_eff, feat_in), lambda i: (i, 0)),   # x rows
                pl.BlockSpec((feat_in, feat_out), lambda i: (0, 0)), # W1
                pl.BlockSpec((3, feat_out), lambda i: (0, 0)),       # b1/g1/beta1
                pl.BlockSpec((feat_out, out_pad), lambda i: (0, 0)), # W2 (padded)
                pl.BlockSpec((3, out_pad), lambda i: (0, 0)),        # b2/g2/beta2 (padded)
            ],
            out_specs=pl.BlockSpec((tm_eff, out_pad), lambda i: (i, 0)),
        ),
        compiler_params=pltpu.CompilerParams(
            dimension_semantics=("parallel",),
            vmem_limit_bytes=48 * 1024 * 1024),
        cost_estimate=cost,
    )(x2d, w1, vecs1, w2p, vecs2)

    out = out[:M, :out_dim]
    return out.reshape(*lead_shape, out_dim)


def init_params(key, feat_in, feat_out, out_dim):
    """Deterministic synthetic parameter init (shapes match the PyTorch module)."""
    k1, k2, k3, k4 = jax.random.split(key, 4)
    w1 = jax.random.uniform(k1, (feat_in, feat_out), jnp.float32,
                            -1.0 / feat_in ** 0.5, 1.0 / feat_in ** 0.5)
    b1 = jax.random.uniform(k2, (1, feat_out), jnp.float32,
                            -1.0 / feat_in ** 0.5, 1.0 / feat_in ** 0.5)
    g1 = jnp.ones((1, feat_out), jnp.float32)
    be1 = jnp.zeros((1, feat_out), jnp.float32)
    w2 = jax.random.uniform(k3, (feat_out, out_dim), jnp.float32,
                            -1.0 / feat_out ** 0.5, 1.0 / feat_out ** 0.5)
    b2 = jax.random.uniform(k4, (1, out_dim), jnp.float32,
                            -1.0 / feat_out ** 0.5, 1.0 / feat_out ** 0.5)
    g2 = jnp.ones((1, out_dim), jnp.float32)
    be2 = jnp.zeros((1, out_dim), jnp.float32)
    return (w1, b1, g1, be1, w2, b2, g2, be2)


def _layernorm_ref(x, gamma, beta):
    mu = jnp.mean(x, axis=-1, keepdims=True)
    var = jnp.mean((x - mu) ** 2, axis=-1, keepdims=True)
    return (x - mu) * jax.lax.rsqrt(var + EPS) * gamma + beta


def reference(feat, params):
    """Pure-JAX reference for correctness check."""
    w1, b1, g1, be1, w2, b2, g2, be2 = params
    h = jnp.maximum(feat @ w1 + b1, 0.0)
    h = _layernorm_ref(h, g1, be1)
    y = jnp.maximum(h @ w2 + b2, 0.0)
    return _layernorm_ref(y, g2, be2)


if __name__ == "__main__":
    key = jax.random.PRNGKey(0)
    k1, k2, k3, k_params = jax.random.split(key, 4)

    feat_in, feat_out, out_dim = 32, 64, 32
    params = init_params(k_params, feat_in, feat_out, out_dim)
    # `context` is unused by ContextFreeBaseStationEmbedding.forward.

    # Case 1: small, sublane-aligned rows (M = 16), single grid step.
    feat = jax.random.normal(k1, (2, 8, feat_in), jnp.float32)
    out = context_free_bs_embedding(feat, params)
    jax.block_until_ready(out)
    ref = reference(feat, params)
    assert out.shape == (2, 8, out_dim)
    assert jnp.allclose(out, ref, atol=2e-5, rtol=2e-5), "mismatch (aligned)"

    # Case 2: rows not a multiple of the sublane (M = 21) -> padded tail path.
    feat2 = jax.random.normal(k2, (3, 7, feat_in), jnp.float32)
    out2 = context_free_bs_embedding(feat2, params)
    jax.block_until_ready(out2)
    ref2 = reference(feat2, params)
    assert out2.shape == (3, 7, out_dim)
    assert jnp.allclose(out2, ref2, atol=2e-5, rtol=2e-5), "mismatch (padded)"

    # Case 3: larger M (1600) -> tile clamp + 2-step 'parallel' grid path.
    feat3 = jax.random.normal(k3, (40, 40, feat_in), jnp.float32)
    out3 = context_free_bs_embedding(feat3, params)
    jax.block_until_ready(out3)
    ref3 = reference(feat3, params)
    assert out3.shape == (40, 40, out_dim)
    assert jnp.allclose(out3, ref3, atol=2e-5, rtol=2e-5), "mismatch (multi-step)"

    print("KERNEL_OK")
</pallas_src>

<mosaic_0001>
module attributes {stable_mosaic.version = 11 : i64} {
  func.func @_bs_embed_kernel(%arg0: i32, %arg1: memref<16x32xf32, #tpu.memory_space<vmem>>, %arg2: memref<32x64xf32, #tpu.memory_space<vmem>>, %arg3: memref<3x64xf32, #tpu.memory_space<vmem>>, %arg4: memref<64x128xf32, #tpu.memory_space<vmem>>, %arg5: memref<3x128xf32, #tpu.memory_space<vmem>>, %arg6: memref<16x128xf32, #tpu.memory_space<vmem>>) attributes {dimension_semantics = [#tpu.dimension_semantics<parallel>], iteration_bounds = array<i64: 1>, scalar_prefetch = 0 : i64, scratch_operands = 0 : i64, tpu.core_type = #tpu.core_type<tc>, window_params = [{transform_indices = @transform_0, window_bounds = array<i64: 16, 32>}, {pipeline_mode = #tpu.pipeline_mode<synchronous>, transform_indices = @transform_1, window_bounds = array<i64: 32, 64>}, {pipeline_mode = #tpu.pipeline_mode<synchronous>, transform_indices = @transform_2, window_bounds = array<i64: 3, 64>}, {pipeline_mode = #tpu.pipeline_mode<synchronous>, transform_indices = @transform_3, window_bounds = array<i64: 64, 128>}, {pipeline_mode = #tpu.pipeline_mode<synchronous>, transform_indices = @transform_4, window_bounds = array<i64: 3, 128>}, {transform_indices = @transform_5, window_bounds = array<i64: 16, 128>}]} {
    %c0 = arith.constant 0 : index
    %c0_0 = arith.constant 0 : index
    %0 = vector.load %arg1[%c0, %c0_0] : memref<16x32xf32, #tpu.memory_space<vmem>>, vector<16x32xf32>
    %c0_1 = arith.constant 0 : index
    %c0_2 = arith.constant 0 : index
    %1 = vector.load %arg3[%c0_1, %c0_2] : memref<3x64xf32, #tpu.memory_space<vmem>>, vector<1x64xf32>
    %c1 = arith.constant 1 : index
    %c0_3 = arith.constant 0 : index
    %2 = vector.load %arg3[%c1, %c0_3] : memref<3x64xf32, #tpu.memory_space<vmem>>, vector<1x64xf32>
    %c2 = arith.constant 2 : index
    %c0_4 = arith.constant 0 : index
    %3 = vector.load %arg3[%c2, %c0_4] : memref<3x64xf32, #tpu.memory_space<vmem>>, vector<1x64xf32>
    %c0_5 = arith.constant 0 : index
    %c0_6 = arith.constant 0 : index
    %4 = vector.load %arg5[%c0_5, %c0_6] : memref<3x128xf32, #tpu.memory_space<vmem>>, vector<1x128xf32>
    %c1_7 = arith.constant 1 : index
    %c0_8 = arith.constant 0 : index
    %5 = vector.load %arg5[%c1_7, %c0_8] : memref<3x128xf32, #tpu.memory_space<vmem>>, vector<1x128xf32>
    %c2_9 = arith.constant 2 : index
    %c0_10 = arith.constant 0 : index
    %6 = vector.load %arg5[%c2_9, %c0_10] : memref<3x128xf32, #tpu.memory_space<vmem>>, vector<1x128xf32>
    %c0_11 = arith.constant 0 : index
    %c0_12 = arith.constant 0 : index
    %7 = vector.load %arg2[%c0_11, %c0_12] : memref<32x64xf32, #tpu.memory_space<vmem>>, vector<32x64xf32>
    %cst = arith.constant dense<0.000000e+00> : vector<16x64xf32>
    %8 = tpu.matmul %0, %7, %cst {dimension_numbers = #tpu.dot_dimension_numbers<[1], [0], [0], [1], [0, 0, 1, 1], [], []>} : vector<16x32xf32>, vector<32x64xf32>, vector<16x64xf32> -> vector<16x64xf32>
    %9 = vector.broadcast %1 : vector<1x64xf32> to vector<16x64xf32>
    %10 = arith.addf %8, %9 : vector<16x64xf32>
    %cst_13 = arith.constant 0.000000e+00 : f32
    %11 = vector.broadcast %cst_13 : f32 to vector<16x64xf32>
    %12 = arith.maximumf %10, %11 : vector<16x64xf32>
    %cst_14 = arith.constant dense<0.000000e+00> : vector<16xf32>
    %13 = vector.multi_reduction <add>, %12, %cst_14 [1] : vector<16x64xf32> to vector<16xf32>
    %14 = vector.shape_cast %13 : vector<16xf32> to vector<16x1xf32>
    %cst_15 = arith.constant 6.400000e+01 : f32
    %15 = vector.broadcast %cst_15 : f32 to vector<16x1xf32>
    %16 = arith.divf %14, %15 : vector<16x1xf32>
    %17 = vector.broadcast %16 : vector<16x1xf32> to vector<16x64xf32>
    %18 = arith.subf %12, %17 : vector<16x64xf32>
    %19 = arith.mulf %18, %18 : vector<16x64xf32>
    %cst_16 = arith.constant dense<0.000000e+00> : vector<16xf32>
    %20 = vector.multi_reduction <add>, %19, %cst_16 [1] : vector<16x64xf32> to vector<16xf32>
    %21 = vector.shape_cast %20 : vector<16xf32> to vector<16x1xf32>
    %cst_17 = arith.constant 6.400000e+01 : f32
    %22 = vector.broadcast %cst_17 : f32 to vector<16x1xf32>
    %23 = arith.divf %21, %22 : vector<16x1xf32>
    %cst_18 = arith.constant 9.99999974E-6 : f32
    %24 = vector.broadcast %cst_18 : f32 to vector<16x1xf32>
    %25 = arith.addf %23, %24 : vector<16x1xf32>
    %26 = math.rsqrt %25 : vector<16x1xf32>
    %27 = vector.broadcast %26 : vector<16x1xf32> to vector<16x64xf32>
    %28 = arith.mulf %18, %27 : vector<16x64xf32>
    %29 = vector.broadcast %2 : vector<1x64xf32> to vector<16x64xf32>
    %30 = arith.mulf %28, %29 : vector<16x64xf32>
    %31 = vector.broadcast %3 : vector<1x64xf32> to vector<16x64xf32>
    %32 = arith.addf %30, %31 : vector<16x64xf32>
    %c0_19 = arith.constant 0 : index
    %c0_20 = arith.constant 0 : index
    %33 = vector.load %arg4[%c0_19, %c0_20] : memref<64x128xf32, #tpu.memory_space<vmem>>, vector<64x128xf32>
    %cst_21 = arith.constant dense<0.000000e+00> : vector<16x128xf32>
    %34 = tpu.matmul %32, %33, %cst_21 {dimension_numbers = #tpu.dot_dimension_numbers<[1], [0], [0], [1], [0, 0, 1, 1], [], []>} : vector<16x64xf32>, vector<64x128xf32>, vector<16x128xf32> -> vector<16x128xf32>
    %35 = vector.broadcast %4 : vector<1x128xf32> to vector<16x128xf32>
    %36 = arith.addf %34, %35 : vector<16x128xf32>
    %cst_22 = arith.constant 0.000000e+00 : f32
    %37 = vector.broadcast %cst_22 : f32 to vector<16x128xf32>
    %38 = arith.maximumf %36, %37 : vector<16x128xf32>
    %39 = tpu.iota {dimensions = array<i32: 1>} : vector<1x128xi32>
    %c32_i32 = arith.constant 32 : i32
    %40 = vector.broadcast %c32_i32 : i32 to vector<1x128xi32>
    %41 = arith.cmpi slt, %39, %40 : vector<1x128xi32>
    %cst_23 = arith.constant dense<0.000000e+00> : vector<16xf32>
    %42 = vector.multi_reduction <add>, %38, %cst_23 [1] : vector<16x128xf32> to vector<16xf32>
    %43 = vector.shape_cast %42 : vector<16xf32> to vector<16x1xf32>
    %cst_24 = arith.constant 3.125000e-02 : f32
    %44 = vector.broadcast %cst_24 : f32 to vector<16x1xf32>
    %45 = arith.mulf %43, %44 : vector<16x1xf32>
    %46 = vector.broadcast %45 : vector<16x1xf32> to vector<16x128xf32>
    %47 = arith.subf %38, %46 : vector<16x128xf32>
    %cst_25 = arith.constant 0.000000e+00 : f32
    %48 = vector.shape_cast %41 : vector<1x128xi1> to vector<1x128xi1>
    %49 = vector.broadcast %48 : vector<1x128xi1> to vector<16x128xi1>
    %50 = vector.broadcast %cst_25 : f32 to vector<16x128xf32>
    %51 = arith.select %49, %47, %50 : vector<16x128xi1>, vector<16x128xf32>
    %52 = arith.mulf %51, %51 : vector<16x128xf32>
    %cst_26 = arith.constant dense<0.000000e+00> : vector<16xf32>
    %53 = vector.multi_reduction <add>, %52, %cst_26 [1] : vector<16x128xf32> to vector<16xf32>
    %54 = vector.shape_cast %53 : vector<16xf32> to vector<16x1xf32>
    %cst_27 = arith.constant 3.125000e-02 : f32
    %55 = vector.broadcast %cst_27 : f32 to vector<16x1xf32>
    %56 = arith.mulf %54, %55 : vector<16x1xf32>
    %cst_28 = arith.constant 9.99999974E-6 : f32
    %57 = vector.broadcast %cst_28 : f32 to vector<16x1xf32>
    %58 = arith.addf %56, %57 : vector<16x1xf32>
    %59 = math.rsqrt %58 : vector<16x1xf32>
    %60 = vector.broadcast %59 : vector<16x1xf32> to vector<16x128xf32>
    %61 = arith.mulf %51, %60 : vector<16x128xf32>
    %62 = vector.broadcast %5 : vector<1x128xf32> to vector<16x128xf32>
    %63 = arith.mulf %61, %62 : vector<16x128xf32>
    %64 = vector.broadcast %6 : vector<1x128xf32> to vector<16x128xf32>
    %65 = arith.addf %63, %64 : vector<16x128xf32>
    %c0_29 = arith.constant 0 : index
    %c0_30 = arith.constant 0 : index
    %66 = vector.load %arg6[%c0_29, %c0_30] : memref<16x128xf32, #tpu.memory_space<vmem>>, vector<16x128xf32>
    tpu.vector_store %arg6[%c0_29, %c0_30], %65 {strides = array<i32>} : memref<16x128xf32, #tpu.memory_space<vmem>>, vector<16x128xf32>,
    return
  }
  func.func @transform_0(%arg0: i32) -> (i32, i32) {
    %c0_i32 = arith.constant 0 : i32
    %c0_i32_0 = arith.constant 0 : i32
    return %arg0, %c0_i32 : i32, i32
  }
  func.func @transform_1(%arg0: i32) -> (i32, i32) {
    %c0_i32 = arith.constant 0 : i32
    %c0_i32_0 = arith.constant 0 : i32
    %c0_i32_1 = arith.constant 0 : i32
    return %c0_i32, %c0_i32_0 : i32, i32
  }
  func.func @transform_2(%arg0: i32) -> (i32, i32) {
    %c0_i32 = arith.constant 0 : i32
    %c0_i32_0 = arith.constant 0 : i32
    %c0_i32_1 = arith.constant 0 : i32
    return %c0_i32, %c0_i32_0 : i32, i32
  }
  func.func @transform_3(%arg0: i32) -> (i32, i32) {
    %c0_i32 = arith.constant 0 : i32
    %c0_i32_0 = arith.constant 0 : i32
    %c0_i32_1 = arith.constant 0 : i32
    return %c0_i32, %c0_i32_0 : i32, i32
  }
  func.func @transform_4(%arg0: i32) -> (i32, i32) {
    %c0_i32 = arith.constant 0 : i32
    %c0_i32_0 = arith.constant 0 : i32
    %c0_i32_1 = arith.constant 0 : i32
    return %c0_i32, %c0_i32_0 : i32, i32
  }
  func.func @transform_5(%arg0: i32) -> (i32, i32) {
    %c0_i32 = arith.constant 0 : i32
    %c0_i32_0 = arith.constant 0 : i32
    return %arg0, %c0_i32 : i32, i32
  }
}

</mosaic_0001>

<bundles_post_ra>
// kernel: context_free_bs_embedding.1
= control target key start
LH: loop header
LB: loop body
LE: loop exit
PB: predicated region body
PF: predicated region fallthrough
CT: control target
= control target key end

     0   :  { %vm36_vm0 = vcmask 261120   ;;  %vm120_vm1 = vcmask 523264   ;;  %v255_v62 = vlaneseq  ;;  %s492_s1 = inlined_call_operand.vmem [shape: f32[32,64], index: 1, kind: input, shape index: {}]   ;;  %s493_s0 = inlined_call_operand.vmem [shape: f32[16,32], index: 0, kind: input, shape index: {}]   ;;  %s494_s2 = inlined_call_operand.vmem [shape: f32[3,64], index: 2, kind: input, shape index: {}]   ;;  %s495_s3 = inlined_call_operand.vmem [shape: f32[64,128], index: 3, kind: input, shape index: {}]   ;;  %s496_s4 = inlined_call_operand.vmem [shape: f32[3,128], index: 4, kind: input, shape index: {}]   ;;  %s497_s5 = inlined_call_operand.vmem [shape: f32[16,128], index: 5, kind: output, shape index: {}]  }
   0x1   :  { %v28_v0 = vld [vmem:[%s492_s1] sm:$0xff]  ;;  %v29_v1 = vld [vmem:[%s492_s1 + $0x8] sm:$0xff]  ;;  %v30_v2 = vld [vmem:[%s492_s1 + $0x10] sm:$0xff] }
   0x2   :  { %v358_v3 = vpack.c.bf16 %v29_v1, %v28_v0  ;;  %v31_v4 = vld [vmem:[%s492_s1 + $0x18] sm:$0xff]  ;;  %v20_v5 = vld [vmem:[%s493_s0] sm:$0xff]  ;;  %v21_v7 = vld [vmem:[%s493_s0 + $0x8] sm:$0xff]  ;;  %v256_v63 = vand.u32 127, %v255_v62 }
   0x3   :  { %v362_v6 = vpack.c.bf16 %v31_v4, %v30_v2  ;;  %336 = vmatprep.mubr.msk.f32.mxu0 %vm36_vm0, %v20_v5  ;;  %v302_v8 = vld [vmem:[%s494_s2] ss:$0 sm:$0xff]  ;;  %v161_v28 = vld [vmem:[%s495_s3 + $0x8] sm:$0xff]  ;;  %v162_v30 = vld [vmem:[%s495_s3 + $0x10] sm:$0xff] }
   0x4   :  { %359 = vmatprep.subr.bf16.mxu0 %v358_v3  ;;  %v160_v27 = vld [vmem:[%s495_s3] sm:$0xff]  ;;  %v163_v31 = vld [vmem:[%s495_s3 + $0x18] sm:$0xff]  ;;  %v165_v34 = vld [vmem:[%s495_s3 + $0x28] sm:$0xff]  ;;  %vm257_vm2 = vcmp.lt.s32.totalorder %v256_v63, 32 }
   0x5   :  { %361 = vmatpush3.bf16.msra.mxu0 %v358_v3  ;;  %v366_v29 = vpack.c.bf16 %v161_v28, %v160_v27  ;;  %v164_v32 = vld [vmem:[%s495_s3 + $0x20] sm:$0xff]  ;;  %v370_v33 = vpack.c.bf16 %v163_v31, %v162_v30  ;;  %v166_v36 = vld [vmem:[%s495_s3 + $0x30] sm:$0xff]  ;;  %v167_v37 = vld [vmem:[%s495_s3 + $0x38] sm:$0xff] }
   0x6   :  { %363 = vmatprep.subr.bf16.mxu0 %v362_v6  ;;  %v374_v35 = vpack.c.bf16 %v165_v34, %v164_v32  ;;  %v378_v38 = vpack.c.bf16 %v167_v37, %v166_v36  ;;  %v305_v46 = vld [vmem:[%s494_s2 + $0x1] ss:$0 sm:$0xff]  ;;  %v306_v48 = vld [vmem:[%s494_s2 + $0x2] ss:$0 sm:$0xff]  ;;  %v307_v55 = vld [vmem:[%s496_s4] ss:$0 sm:$0xff] }
   0x7   :  { %367 = vmatprep.subr.bf16.mxu1 %v366_v29 }
   0x8   :  { %369 = vmatpush3.bf16.msra.mxu1 %v366_v29 }
   0x9   :  { %365 = vmatpush3.bf16.msra.mxu0 %v362_v6  ;;  %371 = vmatprep.subr.bf16.mxu1 %v370_v33 }
   0xc   :  { %337 = vmatmul.mubr.msk.f32.vlgmr.msra.gmra.mrb[0].mxu0 %vm36_vm0, %v21_v7  ;;  %373 = vmatpush3.bf16.msra.mxu1 %v370_v33 }
   0xd   :  { %375 = vmatprep.subr.bf16.mxu1 %v374_v35 }
  0x10   :  { %377 = vmatpush3.bf16.msra.mxu1 %v374_v35 }
  0x11   :  { %379 = vmatprep.subr.bf16.mxu1 %v378_v38 }
  0x14   :  { %381 = vmatpush3.bf16.msra.mxu1 %v378_v38 }
  0xdf   :  { %v338_v9 = vpop.f32.mrb[0].mxu0 }
  0xe0   :  { %v109_v10 = vpop.f32.mrb[1].mxu0  ;;  %v115_v11 = vadd.f32 %v338_v9, %v302_v8 }
  0xe1   :  { %v110_v12 = vadd.f32 %v302_v8, %v109_v10 }
  0xe2   :  { %v119_v14 = vmax.f32 %v115_v11, 0.0 }
  0xe3   :  { %v118_v13 = vmax.f32 %v110_v12, 0.0 }
  0xe4   :  { %v124_v16 = vsel %vm120_vm1, %v119_v14, 0.0 }
  0xe5   :  { %v121_v15 = vsel %vm120_vm1, %v118_v13, 0.0 }
  0xe6   :  { %122 = vadd.xlane.f32.xlu0 %v121_v15 }
  0xea   :  { %125 = vadd.xlane.f32.xlu0 %v124_v16 }
 0x173   :  { %v123_v17 = vpop.xlane.xlu0 %122 }
 0x174   :  { %v128_v18 = vmul.f32 0.015625, %v123_v17  ;;  %v310_v17 = vld [vmem:[%s496_s4 + $0x1] ss:$0 sm:$0xff] }
 0x176   :  { %v130_v19 = vsub.f32 %v118_v13, %v128_v18 }
 0x177   :  { %v126_v20 = vpop.xlane.xlu0 %125 }
 0x178   :  { %v129_v21 = vmul.f32 0.015625, %v126_v20  ;;  %v132_v22 = vmul.f32 %v130_v19, %v130_v19  ;;  %v311_v20 = vld [vmem:[%s496_s4 + $0x2] ss:$0 sm:$0xff] }
 0x17a   :  { %v131_v23 = vsub.f32 %v119_v14, %v129_v21  ;;  %v134_v24 = vsel %vm120_vm1, %v132_v22, 0.0 }
 0x17b   :  { %135 = vadd.xlane.f32.xlu1 %v134_v24 }
 0x17c   :  { %v133_v25 = vmul.f32 %v131_v23, %v131_v23 }
 0x17e   :  { %v137_v26 = vsel %vm120_vm1, %v133_v25, 0.0 }
 0x17f   :  { %138 = vadd.xlane.f32.xlu1 %v137_v26 }
 0x208   :  { %v136_v39 = vpop.xlane.xlu1 %135 }
 0x209   :  { %v140_v40 = vmul.f32 0.015625, %v136_v39 }
 0x20b   :  { %v142_v41 = vadd.f32 1e-05, %v140_v40 }
 0x20c   :  { %v139_v42 = vpop.xlane.xlu1 %138 }
 0x20d   :  { %382 = vrsqrt.f32 %v142_v41  ;;  %v141_v43 = vmul.f32 0.015625, %v139_v42 }
 0x20f   :  { %v143_v44 = vadd.f32 1e-05, %v141_v43 }
 0x211   :  { %384 = vrsqrt.f32 %v143_v44 }
 0x217   :  { %v383_v45 = vpop.eup %382 }
 0x218   :  { %v146_v47 = vmul.f32 %v383_v45, %v130_v19 }
 0x21a   :  { %v152_v49 = vmul.f32 %v305_v46, %v146_v47 }
 0x21b   :  { %v385_v50 = vpop.eup %384 }
 0x21c   :  { %v147_v51 = vmul.f32 %v385_v50, %v131_v23  ;;  %v158_v52 = vadd.f32 %v306_v48, %v152_v49 }
 0x21e   :  { %v153_v53 = vmul.f32 %v305_v46, %v147_v51  ;;  %355 = vmatprep.mubr.msk.f32.mxu1 %vm120_vm1, %v158_v52 }
 0x220   :  { %v159_v54 = vadd.f32 %v306_v48, %v153_v53 }
 0x222   :  { %356 = vmatmul.mubr.msk.f32.vlgmr.msra.gmra.mrb[0].mxu1 %vm120_vm1, %v159_v54 }
 0x2f5   :  { %v357_v56 = vpop.f32.mrb[0].mxu1 }
 0x2f6   :  { %v250_v57 = vadd.f32 %v357_v56, %v307_v55  ;;  %v244_v58 = vpop.f32.mrb[1].mxu1 }
 0x2f7   :  { %v245_v59 = vadd.f32 %v307_v55, %v244_v58 }
 0x2f8   :  { %v254_v60 = vmax.f32 %v250_v57, 0.0 }
 0x2f9   :  { %v253_v61 = vmax.f32 %v245_v59, 0.0 }
 0x2fa   :  { %260 = vadd.xlane.f32.xlu1 %v254_v60 }
 0x2fb   :  { %258 = vadd.xlane.f32.xlu0 %v253_v61 }
 0x387   :  { %v261_v0 = vpop.xlane.xlu1 %260 }
 0x388   :  { %v263_v1 = vmul.f32 0.03125, %v261_v0  ;;  %v259_v2 = vpop.xlane.xlu0 %258 }
 0x389   :  { %v262_v3 = vmul.f32 0.03125, %v259_v2 }
 0x38a   :  { %v265_v4 = vsub.f32 %v254_v60, %v263_v1 }
 0x38b   :  { %v264_v5 = vsub.f32 %v253_v61, %v262_v3 }
 0x38c   :  { %v269_v6 = vsel %vm257_vm2, %v265_v4, 0.0 }
 0x38d   :  { %v271_v7 = vmul.f32 %v269_v6, %v269_v6  ;;  %v268_v8 = vsel %vm257_vm2, %v264_v5, 0.0 }
 0x38e   :  { %v270_v9 = vmul.f32 %v268_v8, %v268_v8 }
 0x38f   :  { %274 = vadd.xlane.f32.xlu1 %v271_v7 }
 0x390   :  { %272 = vadd.xlane.f32.xlu0 %v270_v9 }
 0x41c   :  { %v275_v10 = vpop.xlane.xlu1 %274 }
 0x41d   :  { %v277_v11 = vmul.f32 0.03125, %v275_v10  ;;  %v273_v12 = vpop.xlane.xlu0 %272 }
 0x41e   :  { %v276_v13 = vmul.f32 0.03125, %v273_v12 }
 0x41f   :  { %v279_v14 = vadd.f32 1e-05, %v277_v11 }
 0x420   :  { %v278_v15 = vadd.f32 1e-05, %v276_v13 }
 0x421   :  { %386 = vrsqrt.f32 %v279_v14 }
 0x422   :  { %388 = vrsqrt.f32 %v278_v15 }
 0x42b   :  { %v387_v16 = vpop.eup %386 }
 0x42c   :  { %v389_v18 = vpop.eup %388  ;;  %v283_v19 = vmul.f32 %v387_v16, %v269_v6 }
 0x42d   :  { %v282_v21 = vmul.f32 %v389_v18, %v268_v8 }
 0x42e   :  { %v289_v22 = vmul.f32 %v310_v17, %v283_v19 }
 0x42f   :  { %v288_v23 = vmul.f32 %v310_v17, %v282_v21 }
 0x430   :  { %v295_v24 = vadd.f32 %v311_v20, %v289_v22 }
 0x431   :  { %v294_v25 = vadd.f32 %v311_v20, %v288_v23 }
 0x432   :  { %297 = vst [vmem:[%s497_s5 + $0x8] sm:$0xff] %v295_v24 }
 0x433   :  { %296 = vst [vmem:[%s497_s5] sm:$0xff] %v294_v25 }

</bundles_post_ra>
